<compile_context>
chip_gen: v7x
topology: tpu7x:2x2x1
jax: 0.10.0
libtpu: 0.0.40
codegen_flags: <defaults>
</compile_context>

<pallas_src>
import functools
import math

import jax
import jax.numpy as jnp
from jax import lax
from jax.experimental import pallas as pl
from jax.experimental.pallas import tpu as pltpu


def _pick_tile(dim, candidates):
    for c in candidates:
        if dim % c == 0:
            return c
    return dim


# Projection (linear) tile candidates — capped for v5e/v7x VMEM headroom.
_LIN_TM_CAND = (512, 256, 128, 64, 32, 16, 8)
_LIN_TL_CAND = (256, 128)
# Attention tile candidates — keep (tq, tkv) f32 intermediates <= 32 vregs.
_ATT_TQ_CAND = (128, 64, 32, 16, 8)
_ATT_TKV_CAND = (256, 128, 64, 32, 16, 8)


# ------------------------- tiled linear (MXU) kernels ------------------------
# Weights arrive pre-transposed as (in_dim, out_dim): canonical (M,K)x(K,N).

def _linear_kernel(x_ref, w_ref, o_ref, acc_ref):
    k = pl.program_id(2)

    @pl.when(k == 0)
    def _():
        acc_ref[...] = jnp.zeros_like(acc_ref)

    acc_ref[...] += jnp.dot(x_ref[...], w_ref[...],
                            preferred_element_type=jnp.float32)

    @pl.when(k == pl.num_programs(2) - 1)
    def _():
        o_ref[...] = acc_ref[...].astype(o_ref.dtype)


def _linear_bias_kernel(x_ref, w_ref, b_ref, o_ref, acc_ref):
    k = pl.program_id(2)

    @pl.when(k == 0)
    def _():
        acc_ref[...] = jnp.zeros_like(acc_ref)

    acc_ref[...] += jnp.dot(x_ref[...], w_ref[...],
                            preferred_element_type=jnp.float32)

    @pl.when(k == pl.num_programs(2) - 1)
    def _():
        o_ref[...] = (acc_ref[...] + b_ref[...]).astype(o_ref.dtype)


def pallas_linear(x, w_t, b=None):
    """x: (T, in_dim); w_t: (in_dim, out_dim) (pre-transposed); b: (out_dim,)."""
    T, in_dim = x.shape
    out_dim = w_t.shape[1]
    tm = _pick_tile(T, _LIN_TM_CAND)
    tn = _pick_tile(out_dim, _LIN_TL_CAND)
    tk = _pick_tile(in_dim, _LIN_TL_CAND)
    grid = (T // tm, out_dim // tn, in_dim // tk)
    itemsize = jnp.dtype(x.dtype).itemsize
    cost = pl.CostEstimate(
        flops=int(2 * T * out_dim * in_dim),
        transcendentals=0,
        bytes_accessed=int(itemsize * (x.size + w_t.size + T * out_dim)),
    )
    cparams = pltpu.CompilerParams(
        dimension_semantics=("parallel", "parallel", "arbitrary"))
    if b is None:
        return pl.pallas_call(
            _linear_kernel,
            out_shape=jax.ShapeDtypeStruct((T, out_dim), x.dtype),
            grid=grid,
            in_specs=[
                pl.BlockSpec((tm, tk), lambda i, j, k: (i, k)),
                pl.BlockSpec((tk, tn), lambda i, j, k: (k, j)),
            ],
            out_specs=pl.BlockSpec((tm, tn), lambda i, j, k: (i, j)),
            scratch_shapes=[pltpu.VMEM((tm, tn), jnp.float32)],
            compiler_params=cparams,
            cost_estimate=cost,
        )(x, w_t)
    b2 = b.reshape(1, out_dim)
    return pl.pallas_call(
        _linear_bias_kernel,
        out_shape=jax.ShapeDtypeStruct((T, out_dim), x.dtype),
        grid=grid,
        in_specs=[
            pl.BlockSpec((tm, tk), lambda i, j, k: (i, k)),
            pl.BlockSpec((tk, tn), lambda i, j, k: (k, j)),
            pl.BlockSpec((1, tn), lambda i, j, k: (0, j)),
        ],
        out_specs=pl.BlockSpec((tm, tn), lambda i, j, k: (i, j)),
        scratch_shapes=[pltpu.VMEM((tm, tn), jnp.float32)],
        compiler_params=cparams,
        cost_estimate=cost,
    )(x, w_t, b2)


# ------------------ fused K/V projection (shared context tile) ---------------

def _kv_proj_kernel(ctx_ref, wk_ref, wv_ref, k_out_ref, v_out_ref,
                    acck_ref, accv_ref):
    kk = pl.program_id(2)

    @pl.when(kk == 0)
    def _():
        acck_ref[...] = jnp.zeros_like(acck_ref)
        accv_ref[...] = jnp.zeros_like(accv_ref)

    ctx = ctx_ref[...]
    acck_ref[...] += jnp.dot(ctx, wk_ref[...],
                             preferred_element_type=jnp.float32)
    accv_ref[...] += jnp.dot(ctx, wv_ref[...],
                             preferred_element_type=jnp.float32)

    @pl.when(kk == pl.num_programs(2) - 1)
    def _():
        k_out_ref[...] = acck_ref[...].astype(k_out_ref.dtype)
        v_out_ref[...] = accv_ref[...].astype(v_out_ref.dtype)


def pallas_kv_proj(ctx, wk_t, wv_t):
    """ctx: (T, in_dim); wk_t, wv_t: (in_dim, out_dim) -> k, v each (T, out_dim)."""
    T, in_dim = ctx.shape
    out_dim = wk_t.shape[1]
    tm = _pick_tile(T, _LIN_TM_CAND)
    tn = _pick_tile(out_dim, _LIN_TL_CAND)
    tk = _pick_tile(in_dim, _LIN_TL_CAND)
    grid = (T // tm, out_dim // tn, in_dim // tk)
    itemsize = jnp.dtype(ctx.dtype).itemsize
    cost = pl.CostEstimate(
        flops=int(4 * T * out_dim * in_dim),
        transcendentals=0,
        bytes_accessed=int(itemsize * (ctx.size + wk_t.size + wv_t.size
                                       + 2 * T * out_dim)),
    )
    return pl.pallas_call(
        _kv_proj_kernel,
        out_shape=(jax.ShapeDtypeStruct((T, out_dim), ctx.dtype),
                   jax.ShapeDtypeStruct((T, out_dim), ctx.dtype)),
        grid=grid,
        in_specs=[
            pl.BlockSpec((tm, tk), lambda i, j, k: (i, k)),
            pl.BlockSpec((tk, tn), lambda i, j, k: (k, j)),
            pl.BlockSpec((tk, tn), lambda i, j, k: (k, j)),
        ],
        out_specs=(pl.BlockSpec((tm, tn), lambda i, j, k: (i, j)),
                   pl.BlockSpec((tm, tn), lambda i, j, k: (i, j))),
        scratch_shapes=[pltpu.VMEM((tm, tn), jnp.float32),
                        pltpu.VMEM((tm, tn), jnp.float32)],
        compiler_params=pltpu.CompilerParams(
            dimension_semantics=("parallel", "parallel", "arbitrary")),
        cost_estimate=cost,
    )(ctx, wk_t, wv_t)


# ---------------- flash attention, (B, H, seq, D) head-grid layout -----------

def _attn_kernel(q_ref, k_ref, v_ref, o_ref, m_sc, l_sc, acc_sc):
    ki = pl.program_id(3)

    @pl.when(ki == 0)
    def _():
        m_sc[...] = jnp.full_like(m_sc, -jnp.inf)
        l_sc[...] = jnp.zeros_like(l_sc)
        acc_sc[...] = jnp.zeros_like(acc_sc)

    q = q_ref[0, 0]                                       # (tq, D), scale folded
    k = k_ref[0, 0]                                       # (tkv, D)
    v = v_ref[0, 0]                                       # (tkv, D)

    # QK^T in native dtype, f32 accumulation on the MXU.
    s = lax.dot_general(q, k, (((1,), (1,)), ((), ())),
                        preferred_element_type=jnp.float32)   # (tq, tkv)

    m_prev = m_sc[...]                                    # (tq, 1)
    m_new = jnp.maximum(m_prev, jnp.max(s, axis=-1, keepdims=True))
    alpha = jnp.exp(m_prev - m_new)
    p = jnp.exp(s - m_new)
    l_sc[...] = alpha * l_sc[...] + jnp.sum(p, axis=-1, keepdims=True)
    acc_sc[...] = alpha * acc_sc[...] + lax.dot_general(
        p.astype(v.dtype), v, (((1,), (0,)), ((), ())),
        preferred_element_type=jnp.float32)
    m_sc[...] = m_new

    @pl.when(ki == pl.num_programs(3) - 1)
    def _():
        inv_l = pl.reciprocal(l_sc[...], approx=True)     # (tq, 1)
        o_ref[0, 0] = (acc_sc[...] * inv_l).astype(o_ref.dtype)


def pallas_attention(q, k, v):
    """q: (B, H, N, D); k, v: (B, H, M, D) -> (B, H, N, D). Scale pre-folded."""
    B, H, N, D = q.shape
    M = k.shape[2]
    tq = _pick_tile(N, _ATT_TQ_CAND)
    tkv = _pick_tile(M, _ATT_TKV_CAND)
    grid = (B, H, N // tq, M // tkv)
    itemsize = jnp.dtype(q.dtype).itemsize
    cost = pl.CostEstimate(
        flops=int(4 * B * H * N * M * D),
        transcendentals=int(B * H * N * M),
        bytes_accessed=int(itemsize * (q.size + k.size + v.size + q.size)),
    )
    return pl.pallas_call(
        _attn_kernel,
        out_shape=jax.ShapeDtypeStruct((B, H, N, D), q.dtype),
        grid=grid,
        in_specs=[
            pl.BlockSpec((1, 1, tq, D), lambda b, h, qi, ki: (b, h, qi, 0)),
            pl.BlockSpec((1, 1, tkv, D), lambda b, h, qi, ki: (b, h, ki, 0)),
            pl.BlockSpec((1, 1, tkv, D), lambda b, h, qi, ki: (b, h, ki, 0)),
        ],
        out_specs=pl.BlockSpec((1, 1, tq, D), lambda b, h, qi, ki: (b, h, qi, 0)),
        scratch_shapes=[
            pltpu.VMEM((tq, 1), jnp.float32),    # running max m
            pltpu.VMEM((tq, 1), jnp.float32),    # running sum l
            pltpu.VMEM((tq, D), jnp.float32),    # running acc
        ],
        compiler_params=pltpu.CompilerParams(
            dimension_semantics=("parallel", "parallel", "parallel",
                                 "arbitrary")),
        cost_estimate=cost,
    )(q, k, v)


# ----------------------------- module-level wrapper --------------------------

def init_cross_attention_params(key, query_dim, context_dim, heads, dim_head):
    inner_dim = heads * dim_head
    k1, k2, k3, k4, k5 = jax.random.split(key, 5)

    def _lin(k, out_d, in_d):
        # PyTorch nn.Linear default init: U(-1/sqrt(in), 1/sqrt(in))
        bound = 1.0 / math.sqrt(in_d)
        return jax.random.uniform(
            k, (out_d, in_d), jnp.float32, minval=-bound, maxval=bound)

    return {
        "to_q_w": _lin(k1, inner_dim, query_dim),
        "to_k_w": _lin(k2, inner_dim, context_dim),
        "to_v_w": _lin(k3, inner_dim, context_dim),
        "to_out_w": _lin(k4, query_dim, inner_dim),
        "to_out_b": jax.random.uniform(
            k5, (query_dim,), jnp.float32,
            minval=-1.0 / math.sqrt(inner_dim),
            maxval=1.0 / math.sqrt(inner_dim)),
    }


def cross_attention_forward(params, x, context=None, *, heads):
    """x: (B, N, query_dim); context: (B, M, context_dim) or None."""
    B, N, _ = x.shape
    if context is None:
        context = x
    M = context.shape[1]
    inner_dim = params["to_q_w"].shape[0]
    dim_head = inner_dim // heads
    scale = dim_head ** (-0.5)

    # Pre-transpose weights once to (in_dim, out_dim) -> canonical (M,K)x(K,N)
    # tiles in the kernels; fold the softmax scale into the q projection.
    wq_t = (params["to_q_w"] * scale).T
    wk_t = params["to_k_w"].T
    wv_t = params["to_v_w"].T
    wo_t = params["to_out_w"].T

    # Projections (to_q separate; to_k / to_v fused, sharing the context tile).
    q = pallas_linear(x.reshape(B * N, -1), wq_t)
    k, v = pallas_kv_proj(context.reshape(B * M, -1), wk_t, wv_t)

    # (B, seq, H*D) -> (B, H, seq, D): heads become a grid axis so the kernel
    # never slices sub-128-lane head chunks (last block dim = full D extent).
    q = q.reshape(B, N, heads, dim_head).transpose(0, 2, 1, 3)
    k = k.reshape(B, M, heads, dim_head).transpose(0, 2, 1, 3)
    v = v.reshape(B, M, heads, dim_head).transpose(0, 2, 1, 3)

    out = pallas_attention(q, k, v)                        # (B, H, N, D)
    out = out.transpose(0, 2, 1, 3).reshape(B * N, inner_dim)

    # Output projection (+ bias). Dropout p=0.0 -> identity.
    out = pallas_linear(out, wo_t, params["to_out_b"])
    return out.reshape(B, N, -1)


# --------------------------------- reference ---------------------------------

def cross_attention_reference(params, x, context=None, *, heads):
    if context is None:
        context = x
    B, N, _ = x.shape
    M = context.shape[1]
    inner_dim = params["to_q_w"].shape[0]
    dim_head = inner_dim // heads
    q = x @ params["to_q_w"].T
    k = context @ params["to_k_w"].T
    v = context @ params["to_v_w"].T
    q = q.reshape(B, N, heads, dim_head).transpose(0, 2, 1, 3)
    k = k.reshape(B, M, heads, dim_head).transpose(0, 2, 1, 3)
    v = v.reshape(B, M, heads, dim_head).transpose(0, 2, 1, 3)
    s = jnp.einsum("bhnd,bhmd->bhnm", q, k) / math.sqrt(dim_head)
    p = jax.nn.softmax(s, axis=-1)
    o = jnp.einsum("bhnm,bhmd->bhnd", p, v)
    o = o.transpose(0, 2, 1, 3).reshape(B, N, inner_dim)
    return o @ params["to_out_w"].T + params["to_out_b"]


# ------------------------------------ main ------------------------------------

if __name__ == "__main__":
    B, N, M = 2, 16, 8
    query_dim, context_dim = 32, 32
    heads, dim_head = 2, 16

    key = jax.random.PRNGKey(0)
    k_params, k_x, k_ctx = jax.random.split(key, 3)

    params = init_cross_attention_params(
        k_params, query_dim, context_dim, heads, dim_head)
    x = jax.random.normal(k_x, (B, N, query_dim), jnp.float32)
    context = jax.random.normal(k_ctx, (B, M, context_dim), jnp.float32)

    out = cross_attention_forward(params, x, context, heads=heads)
    out = jax.block_until_ready(out)

    ref = cross_attention_reference(params, x, context, heads=heads)
    assert out.shape == (B, N, query_dim), out.shape
    assert jnp.allclose(out, ref, atol=2e-3, rtol=2e-3), (
        float(jnp.max(jnp.abs(out - ref))))

    # Also exercise self-attention path (context=None).
    out_self = jax.block_until_ready(
        cross_attention_forward(params, x, None, heads=heads))
    ref_self = cross_attention_reference(params, x, None, heads=heads)
    assert jnp.allclose(out_self, ref_self, atol=2e-3, rtol=2e-3)

    print("KERNEL_OK")
</pallas_src>

<mosaic_0001>
module attributes {stable_mosaic.version = 11 : i64} {
  func.func @_linear_kernel(%arg0: i32, %arg1: i32, %arg2: i32, %arg3: memref<32x32xf32, #tpu.memory_space<vmem>>, %arg4: memref<32x32xf32, #tpu.memory_space<vmem>>, %arg5: memref<32x32xf32, #tpu.memory_space<vmem>>, %arg6: memref<32x32xf32, #tpu.memory_space<vmem>>) attributes {dimension_semantics = [#tpu.dimension_semantics<parallel>, #tpu.dimension_semantics<parallel>, #tpu.dimension_semantics<arbitrary>], iteration_bounds = array<i64: 1, 1, 1>, scalar_prefetch = 0 : i64, scratch_operands = 1 : i64, tpu.core_type = #tpu.core_type<tc>, window_params = [{transform_indices = @transform_0, window_bounds = array<i64: 32, 32>}, {transform_indices = @transform_1, window_bounds = array<i64: 32, 32>}, {transform_indices = @transform_2, window_bounds = array<i64: 32, 32>}]} {
    %c0_i32 = arith.constant 0 : i32
    %0 = arith.cmpi eq, %arg2, %c0_i32 : i32
    %1 = arith.extui %0 : i1 to i32
    %c0_i32_0 = arith.constant 0 : i32
    %2 = arith.cmpi ne, %1, %c0_i32_0 : i32
    scf.if %2 {
      %cst_10 = arith.constant 0.000000e+00 : f32
      %12 = vector.broadcast %cst_10 : f32 to vector<32x32xf32>
      %c0_11 = arith.constant 0 : index
      %c0_12 = arith.constant 0 : index
      %13 = vector.load %arg6[%c0_11, %c0_12] : memref<32x32xf32, #tpu.memory_space<vmem>>, vector<32x32xf32>
      tpu.vector_store %arg6[%c0_11, %c0_12], %12 {strides = array<i32>} : memref<32x32xf32, #tpu.memory_space<vmem>>, vector<32x32xf32>,
    } else {
    }
    %c0 = arith.constant 0 : index
    %c0_1 = arith.constant 0 : index
    %3 = vector.load %arg6[%c0, %c0_1] : memref<32x32xf32, #tpu.memory_space<vmem>>, vector<32x32xf32>
    %c0_2 = arith.constant 0 : index
    %c0_3 = arith.constant 0 : index
    %4 = vector.load %arg3[%c0_2, %c0_3] : memref<32x32xf32, #tpu.memory_space<vmem>>, vector<32x32xf32>
    %c0_4 = arith.constant 0 : index
    %c0_5 = arith.constant 0 : index
    %5 = vector.load %arg4[%c0_4, %c0_5] : memref<32x32xf32, #tpu.memory_space<vmem>>, vector<32x32xf32>
    %cst = arith.constant dense<0.000000e+00> : vector<32x32xf32>
    %6 = tpu.matmul %4, %5, %cst {dimension_numbers = #tpu.dot_dimension_numbers<[1], [0], [0], [1], [0, 0, 1, 1], [], []>} : vector<32x32xf32>, vector<32x32xf32>, vector<32x32xf32> -> vector<32x32xf32>
    %7 = arith.addf %3, %6 : vector<32x32xf32>
    %c0_6 = arith.constant 0 : index
    %c0_7 = arith.constant 0 : index
    %8 = vector.load %arg6[%c0_6, %c0_7] : memref<32x32xf32, #tpu.memory_space<vmem>>, vector<32x32xf32>
    tpu.vector_store %arg6[%c0_6, %c0_7], %7 {strides = array<i32>} : memref<32x32xf32, #tpu.memory_space<vmem>>, vector<32x32xf32>,
    %c0_i32_8 = arith.constant 0 : i32
    %9 = arith.cmpi eq, %arg2, %c0_i32_8 : i32
    %10 = arith.extui %9 : i1 to i32
    %c0_i32_9 = arith.constant 0 : i32
    %11 = arith.cmpi ne, %10, %c0_i32_9 : i32
    scf.if %11 {
      %c0_10 = arith.constant 0 : index
      %c0_11 = arith.constant 0 : index
      %12 = vector.load %arg6[%c0_10, %c0_11] : memref<32x32xf32, #tpu.memory_space<vmem>>, vector<32x32xf32>
      %c0_12 = arith.constant 0 : index
      %c0_13 = arith.constant 0 : index
      %13 = vector.load %arg5[%c0_12, %c0_13] : memref<32x32xf32, #tpu.memory_space<vmem>>, vector<32x32xf32>
      tpu.vector_store %arg5[%c0_12, %c0_13], %12 {strides = array<i32>} : memref<32x32xf32, #tpu.memory_space<vmem>>, vector<32x32xf32>,
    } else {
    }
    return
  }
  func.func @transform_0(%arg0: i32, %arg1: i32, %arg2: i32) -> (i32, i32) {
    %c0_i32 = arith.constant 0 : i32
    return %arg0, %arg2 : i32, i32
  }
  func.func @transform_1(%arg0: i32, %arg1: i32, %arg2: i32) -> (i32, i32) {
    %c0_i32 = arith.constant 0 : i32
    return %arg2, %arg1 : i32, i32
  }
  func.func @transform_2(%arg0: i32, %arg1: i32, %arg2: i32) -> (i32, i32) {
    %c0_i32 = arith.constant 0 : i32
    return %arg0, %arg1 : i32, i32
  }
}

</mosaic_0001>

<bundles_post_ra>
// kernel: tpu_custom_call.1
= control target key start
LH: loop header
LB: loop body
LE: loop exit
PB: predicated region body
PF: predicated region fallthrough
CT: control target
= control target key end

     0   :  { %7 = vsyncpa [#allocation4], 0  ;;  %s394_s0 = inlined_call_operand.hbm [shape: f32[32,32], index: 0, kind: input, shape index: {}]   ;;  %s395_s1 = inlined_call_operand.hbm [shape: f32[32,32], index: 1, kind: input, shape index: {}]   ;;  %s396_s2 = inlined_call_operand.hbm [shape: f32[32,32], index: 2, kind: output, shape index: {}]  }
   0x1   :  { %8 = vsyncpa [#allocation7], 0 }
   0x2   :  { %9 = vsyncpa [#allocation5], 0  ;;  %s312_s9 = smov [#allocation3]   ;;  %s240_s13 = scalar_lea.hbm %s394_s0, 512 }
   0x3   :  { %s15_s10 = sshll.u32 %s312_s9, 4  ;;  %p241_p0 = scmp.ne.s32.totalorder %s394_s0, %s240_s13  ;;  %s16_s10 = int_to_ptr.vmem [resolvable:$true] %s15_s10 }
   0x4   :  { %p244_p1 = scmp.lt.u32.totalorder %s240_s13, %s394_s0 }
   0x6   :  { %p246_p2 = pnand %p244_p1, %p241_p0 }
   0x8   :  { %249 = shalt.err (!%p246_p2)
}
   0x9   :  { %s250_s18 = scalar_lea.vmem %s16_s10, 512  ;;  %p255_p4 = scmp.lt.s32.totalorder %s16_s10, %s16_s10 }
   0xa   :  { %p251_p3 = scmp.ne.s32.totalorder %s16_s10, %s250_s18  ;;  %p256_p5 = scmp.lt.s32.totalorder %s250_s18, %s250_s18 }
   0xc   :  { %p257_p6 = por %p256_p5, %p255_p4 }
   0xe   :  { %p258_p7 = pnand %p257_p6, %p251_p3 }
  0x10   :  { %261 = shalt.err (!%p258_p7)
}
  0x11   :  { %s313_s19 = smov 128   ;;  %s314_s20 = smov 8  }
  0x12   :  { %21 = dma.hbm_to_vmem [thread:$0]  %s394_s0, 512, %s16_s10, [#allocation4], %s313_s19, %s313_s19, %s314_s20  }
  0x13   :  { %s315_s23 = smov [#allocation6]   ;;  %s262_s27 = scalar_lea.hbm %s395_s1, 512 }
  0x14   :  { %s27_s24 = sshll.u32 %s315_s23, 4  ;;  %p263_p8 = scmp.ne.s32.totalorder %s395_s1, %s262_s27  ;;  %s28_s24 = int_to_ptr.vmem [resolvable:$true] %s27_s24 }
  0x15   :  { %p266_p9 = scmp.lt.u32.totalorder %s262_s27, %s395_s1 }
  0x17   :  { %p268_p10 = pnand %p266_p9, %p263_p8 }
  0x19   :  { %271 = shalt.err (!%p268_p10)
}
  0x1a   :  { %s272_s4 = scalar_lea.vmem %s28_s24, 512  ;;  %p277_p12 = scmp.lt.s32.totalorder %s28_s24, %s28_s24 }
  0x1b   :  { %p273_p11 = scmp.ne.s32.totalorder %s28_s24, %s272_s4  ;;  %p278_p13 = scmp.lt.s32.totalorder %s272_s4, %s272_s4 }
  0x1d   :  { %p279_p0 = por %p278_p13, %p277_p12 }
  0x1f   :  { %p280_p1 = pnand %p279_p0, %p273_p11 }
  0x21   :  { %283 = shalt.err (!%p280_p1)
}
  0x22   :  { %33 = dma.hbm_to_vmem [thread:$0]  %s395_s1, 512, %s28_s24, [#allocation7], %s313_s19, %s313_s19, %s314_s20  }
  0x23   :  { %306 = dma.done.wait [#allocation4], 512  }
  0x24   :  { %307 = vsyncadd [#allocation4], 4294966784 }
  0x25   :  { %308 = dma.done.wait [#allocation7], 512  }
  0x26   :  { %309 = vsyncadd [#allocation7], 4294966784  ;;  %vm44_vm0 = vcmask 261120   ;;  %v316_v0 = vmov 0.0   ;;  %v57_v1 = vld [vmem:[#allocation6] sm:$0xff]  ;;  %v58_v2 = vld [vmem:[#allocation6 + $0x8] sm:$0xff] }
  0x27   :  { %46 = vst.msk [vmem:[#allocation2 + $0x8] sm:$0xff] %vm44_vm0, %v316_v0  ;;  %45 = vst.msk [vmem:[#allocation2] sm:$0xff] %vm44_vm0, %v316_v0  ;;  %v59_v3 = vld [vmem:[#allocation6 + $0x10] sm:$0xff]  ;;  %v222_v4 = vpack.c.bf16 %v58_v2, %v57_v1  ;;  %v60_v5 = vld [vmem:[#allocation6 + $0x18] sm:$0xff]  ;;  %s317_s1 = smov [#allocation8]  }
  0x28   :  { %47 = vst.msk [vmem:[#allocation2 + $0x10] sm:$0xff] %vm44_vm0, %v316_v0  ;;  %48 = vst.msk [vmem:[#allocation2 + $0x18] sm:$0xff] %vm44_vm0, %v316_v0  ;;  %v53_v6 = vld [vmem:[#allocation3] sm:$0xff]  ;;  %v55_v7 = vld [vmem:[#allocation3 + $0x10] sm:$0xff]  ;;  %v226_v8 = vpack.c.bf16 %v60_v5, %v59_v3  ;;  %s183_s6 = sshll.u32 %s317_s1, 4  ;;  %s184_s6 = int_to_ptr.vmem [resolvable:$true] %s183_s6 }
  0x29   :  { %216 = vmatprep.mubr.msk.f32.mxu0 %vm44_vm0, %v53_v6  ;;  %219 = vmatprep.mubr.msk.f32.mxu1 %vm44_vm0, %v55_v7  ;;  %v54_v9 = vld [vmem:[#allocation3 + $0x8] sm:$0xff]  ;;  %v56_v10 = vld [vmem:[#allocation3 + $0x18] sm:$0xff]  ;;  %s284_s7 = scalar_lea.vmem %s184_s6, 512  ;;  %p289_p3 = scmp.lt.s32.totalorder %s184_s6, %s184_s6 }
  0x2a   :  { %223 = vmatprep.subr.bf16.mxu0 %v222_v4  ;;  %230 = vmatprep.subr.bf16.mxu1 %v222_v4  ;;  %p285_p2 = scmp.ne.s32.totalorder %s184_s6, %s284_s7  ;;  %p290_p4 = scmp.lt.s32.totalorder %s284_s7, %s284_s7 }
  0x2b   :  { %225 = vmatpush3.bf16.msra.mxu0 %v222_v4  ;;  %232 = vmatpush3.bf16.msra.mxu1 %v222_v4 }
  0x2c   :  { %227 = vmatprep.subr.bf16.mxu0 %v226_v8  ;;  %231 = vmatprep.subr.bf16.mxu1 %v226_v8  ;;  %p291_p5 = por %p290_p4, %p289_p3 }
  0x2e   :  { %v50_v11 = vld [vmem:[#allocation2 + $0x8] sm:$0xff]  ;;  %v49_v13 = vld [vmem:[#allocation2] sm:$0xff]  ;;  %p292_p6 = pnand %p291_p5, %p285_p2 }
  0x2f   :  { %229 = vmatpush3.bf16.msra.mxu0 %v226_v8  ;;  %233 = vmatpush3.bf16.msra.mxu1 %v226_v8  ;;  %v52_v12 = vld [vmem:[#allocation2 + $0x18] sm:$0xff]  ;;  %v51_v14 = vld [vmem:[#allocation2 + $0x10] sm:$0xff] }
  0x32   :  { %217 = vmatmul.mubr.msk.f32.vlgmr.msra.gmra.mrb[0].mxu0 %vm44_vm0, %v54_v9  ;;  %220 = vmatmul.mubr.msk.f32.vlgmr.msra.gmra.mrb[0].mxu1 %vm44_vm0, %v56_v10 }
 0x105   :  { %v218_v15 = vpop.f32.mrb[0].mxu0  ;;  %v221_v16 = vpop.f32.mrb[0].mxu1 }
 0x106   :  { %v160_v17 = vadd.f32 %v218_v15, %v50_v11  ;;  %v162_v18 = vadd.f32 %v221_v16, %v52_v12  ;;  %v140_v19 = vpop.f32.mrb[1].mxu0  ;;  %v150_v20 = vpop.f32.mrb[1].mxu1 }
 0x107   :  { %v159_v21 = vadd.f32 %v140_v19, %v49_v13  ;;  %v161_v22 = vadd.f32 %v150_v20, %v51_v14 }
 0x108   :  { %164 = vst.msk [vmem:[#allocation2 + $0x8] sm:$0xff] %vm44_vm0, %v160_v17  ;;  %166 = vst.msk [vmem:[#allocation2 + $0x18] sm:$0xff] %vm44_vm0, %v162_v18 }
 0x109   :  { %163 = vst.msk [vmem:[#allocation2] sm:$0xff] %vm44_vm0, %v159_v21  ;;  %165 = vst.msk [vmem:[#allocation2 + $0x10] sm:$0xff] %vm44_vm0, %v161_v22 }
 0x10f   :  { %v171_v23 = vld [vmem:[#allocation2 + $0x8] sm:$0xff]  ;;  %v173_v24 = vld [vmem:[#allocation2 + $0x18] sm:$0xff] }
 0x110   :  { %v170_v25 = vld [vmem:[#allocation2] sm:$0xff]  ;;  %v172_v26 = vld [vmem:[#allocation2 + $0x10] sm:$0xff]  ;;  %175 = vst.msk [vmem:[#allocation8 + $0x8] sm:$0xff] %vm44_vm0, %v171_v23  ;;  %177 = vst.msk [vmem:[#allocation8 + $0x18] sm:$0xff] %vm44_vm0, %v173_v24 }
 0x111   :  { %174 = vst.msk [vmem:[#allocation8] sm:$0xff] %vm44_vm0, %v170_v25  ;;  %176 = vst.msk [vmem:[#allocation8 + $0x10] sm:$0xff] %vm44_vm0, %v172_v26 }
 0x112   :  { %295 = shalt.err (!%p292_p6)
}
 0x113   :  { %s296_s10 = scalar_lea.hbm %s396_s2, 512 }
 0x114   :  { %p297_p7 = scmp.ne.s32.totalorder %s396_s2, %s296_s10  ;;  %p300_p8 = scmp.lt.u32.totalorder %s296_s10, %s396_s2 }
 0x116   :  { %p302_p9 = pnand %p300_p8, %p297_p7 }
 0x118   :  { %305 = shalt.err (!%p302_p9)
}
 0x119   :  { %189 = dma.vmem_to_hbm [thread:$0]  %s184_s6, 512, %s396_s2, [#allocation5], %s313_s19, %s313_s19, %s314_s20  }
 0x11a   :  { %310 = dma.done.wait [#allocation5], 512  }
 0x11b   :  { %311 = vsyncadd [#allocation5], 4294966784 }
 0x11c   :  { %193 = vsyncpa [#allocation4], 1 }
 0x11d   :  { %194 = vsyncpa [#allocation7], 1 }
 0x11e   :  { %195 = vsyncpa [#allocation5], 1 }

</bundles_post_ra>
